<compile_context>
chip_gen: v6e
topology: v6e:2x2x1
jax: 0.10.0
libtpu: 0.0.40
codegen_flags: <defaults>
</compile_context>

<pallas_src>
import functools

import jax
import jax.numpy as jnp
from jax.experimental import pallas as pl
from jax.experimental.pallas import tpu as pltpu


def _round_up(x: int, m: int) -> int:
    return ((x + m - 1) // m) * m


def _cdiv(a: int, b: int) -> int:
    return (a + b - 1) // b


def dense_softmax_kernel(x_ref, w_ref, b_ref, o_ref):
    # x_ref: (TB, K_pad)    -- batch tile, K padded only to a sublane multiple (16)
    # w_ref: (K_pad, N_pad) -- pre-transposed weight, VMEM-resident across the grid
    # b_ref: (1, N_pad)     -- bias (f32), padded lanes = -1e30 so they vanish in softmax
    # o_ref: (TB, N_pad)    -- lane-dense (multiple-of-128) output tile -> unmasked vst
    y = jnp.dot(x_ref[...], w_ref[...], preferred_element_type=jnp.float32)
    y = y + b_ref[...]  # padded logits ~ -1e30

    # Numerically stable softmax along the lane axis; padded lanes contribute
    # exp(-huge) == 0 to the denominator, so the real lanes are exact.
    m = jnp.max(y, axis=-1, keepdims=True)
    e = jnp.exp(y - m)
    s = jnp.sum(e, axis=-1, keepdims=True)
    # Exact division: the kernel is memory/overhead bound, so the divide is
    # free and rows sum to 1 at f32 precision.
    o_ref[...] = (e / s).astype(o_ref.dtype)


@functools.partial(jax.jit, static_argnames=("block_b",))
def _dense_softmax_pallas(x, w, b, *, block_b: int = 4096):
    B, F_in = x.shape
    F_out = w.shape[0]
    dtype = x.dtype

    LANE = 128
    SUB = 8
    # Pad the contraction dim only to a sublane multiple (10 -> 16), NOT to 128.
    K_pad = _round_up(max(F_in, SUB), SUB)
    # Output dim padded to a lane multiple so the store is unmasked / lane-dense.
    N_pad = _round_up(F_out, LANE)

    # Batch tiling: big tiles amortize per-grid-step overhead; derive TB from
    # cdiv(B, num_tiles) so B_pad isn't rounded up by a whole extra tile, and
    # force >= 2 tiles for large B so the "parallel" axis feeds both v7x cores.
    num_tiles = _cdiv(B, block_b)
    if B >= 2048:
        num_tiles = max(num_tiles, 2)
    TB = _round_up(_cdiv(B, num_tiles), SUB)
    B_pad = _round_up(B, TB)

    # Zero-pad x (zeros contribute nothing to the contraction).
    x_p = jnp.zeros((B_pad, K_pad), dtype).at[:B, :F_in].set(x)
    # Pre-transpose + zero-pad the PyTorch (F_out, F_in) weight to (K_pad, N_pad).
    w_p = jnp.zeros((K_pad, N_pad), dtype).at[:F_in, :F_out].set(w.T.astype(dtype))
    # Bias padded with a huge negative so padded logits vanish under softmax.
    b_p = jnp.full((1, N_pad), -1e30, dtype=jnp.float32)
    b_p = b_p.at[0, :F_out].set(b.astype(jnp.float32))

    out = pl.pallas_call(
        dense_softmax_kernel,
        out_shape=jax.ShapeDtypeStruct((B_pad, N_pad), dtype),
        grid=(B_pad // TB,),
        in_specs=[
            pl.BlockSpec((TB, K_pad), lambda i: (i, 0)),     # batch-tiled x
            pl.BlockSpec((K_pad, N_pad), lambda i: (0, 0)),  # VMEM-resident W
            pl.BlockSpec((1, N_pad), lambda i: (0, 0)),      # VMEM-resident b
        ],
        out_specs=pl.BlockSpec((TB, N_pad), lambda i: (i, 0)),
        compiler_params=pltpu.CompilerParams(
            dimension_semantics=("parallel",),      # megacore / 2-TC sharding
            vmem_limit_bytes=32 * 1024 * 1024,      # covers TB=4096 f32 tiles, v5e-safe
        ),
    )(x_p, w_p, b_p)

    # Strip batch + lane padding once, outside the kernel.
    # TODO(synk): for very large B, return the padded (B_pad, N_pad) buffer and
    # slice lazily downstream to avoid the extra writeback pass.
    return out[:B, :F_out]


@functools.partial(jax.jit, static_argnames=("block_b", "force_pallas"))
def dense_softmax(x, w, b, *, block_b: int = 4096, force_pallas: bool = False):
    """Linear(10,10) + softmax(dim=-1). x:(B,F_in), w:(F_out,F_in), b:(F_out,)."""
    B, F_in = x.shape
    # Small-problem fallback: launching a Pallas kernel (plus wrapper pad/slice)
    # costs more than the fused XLA op for tiny batches.
    if not force_pallas and B * F_in < 4096:
        return jax.nn.softmax(x @ w.T.astype(x.dtype) + b.astype(x.dtype), axis=-1)
    return _dense_softmax_pallas(x, w, b, block_b=block_b)


if __name__ == "__main__":
    key = jax.random.PRNGKey(0)
    k_x, k_w, k_b, k_x2 = jax.random.split(key, 4)

    B, F = 8, 10
    # Deterministic "PyTorch-like" init: U(-1/sqrt(fan_in), 1/sqrt(fan_in))
    bound = 1.0 / (F ** 0.5)
    x = jax.random.normal(k_x, (B, F), dtype=jnp.float32)
    w = jax.random.uniform(k_w, (F, F), minval=-bound, maxval=bound, dtype=jnp.float32)
    b = jax.random.uniform(k_b, (F,), minval=-bound, maxval=bound, dtype=jnp.float32)

    def ref_fn(xi):
        return jax.nn.softmax(xi @ w.T + b, axis=-1)

    # 1) Pallas path at the module's native small shape (forced so the kernel runs).
    out = jax.block_until_ready(dense_softmax(x, w, b, force_pallas=True))
    assert out.shape == (B, F)
    assert jnp.allclose(out, ref_fn(x), atol=1e-5, rtol=1e-5)
    assert jnp.allclose(jnp.sum(out, axis=-1), 1.0, atol=1e-5)

    # 2) Multi-tile Pallas path (grid > 1) with a small block_b to exercise tiling.
    B2 = 300
    x2 = jax.random.normal(k_x2, (B2, F), dtype=jnp.float32)
    out2 = jax.block_until_ready(dense_softmax(x2, w, b, block_b=128, force_pallas=True))
    assert out2.shape == (B2, F)
    assert jnp.allclose(out2, ref_fn(x2), atol=1e-5, rtol=1e-5)
    assert jnp.allclose(jnp.sum(out2, axis=-1), 1.0, atol=1e-5)

    # 3) Auto path (small problem -> fused XLA fallback) stays consistent.
    out3 = jax.block_until_ready(dense_softmax(x, w, b))
    assert jnp.allclose(out3, out, atol=1e-5, rtol=1e-5)

    print("KERNEL_OK")
</pallas_src>

<mosaic_0001>
module attributes {stable_mosaic.version = 11 : i64} {
  func.func @dense_softmax_kernel(%arg0: i32, %arg1: memref<8x16xf32, #tpu.memory_space<vmem>>, %arg2: memref<16x128xf32, #tpu.memory_space<vmem>>, %arg3: memref<1x128xf32, #tpu.memory_space<vmem>>, %arg4: memref<8x128xf32, #tpu.memory_space<vmem>>) attributes {dimension_semantics = [#tpu.dimension_semantics<parallel>], iteration_bounds = array<i64: 1>, scalar_prefetch = 0 : i64, scratch_operands = 0 : i64, tpu.core_type = #tpu.core_type<tc>, window_params = [{transform_indices = @transform_0, window_bounds = array<i64: 8, 16>}, {pipeline_mode = #tpu.pipeline_mode<synchronous>, transform_indices = @transform_1, window_bounds = array<i64: 16, 128>}, {pipeline_mode = #tpu.pipeline_mode<synchronous>, transform_indices = @transform_2, window_bounds = array<i64: 1, 128>}, {transform_indices = @transform_3, window_bounds = array<i64: 8, 128>}]} {
    %c0 = arith.constant 0 : index
    %c0_0 = arith.constant 0 : index
    %0 = vector.load %arg1[%c0, %c0_0] : memref<8x16xf32, #tpu.memory_space<vmem>>, vector<8x16xf32>
    %c0_1 = arith.constant 0 : index
    %c0_2 = arith.constant 0 : index
    %1 = vector.load %arg2[%c0_1, %c0_2] : memref<16x128xf32, #tpu.memory_space<vmem>>, vector<16x128xf32>
    %cst = arith.constant dense<0.000000e+00> : vector<8x128xf32>
    %2 = tpu.matmul %0, %1, %cst {dimension_numbers = #tpu.dot_dimension_numbers<[1], [0], [0], [1], [0, 0, 1, 1], [], []>} : vector<8x16xf32>, vector<16x128xf32>, vector<8x128xf32> -> vector<8x128xf32>
    %c0_3 = arith.constant 0 : index
    %c0_4 = arith.constant 0 : index
    %3 = vector.load %arg3[%c0_3, %c0_4] : memref<1x128xf32, #tpu.memory_space<vmem>>, vector<1x128xf32>
    %4 = vector.broadcast %3 : vector<1x128xf32> to vector<8x128xf32>
    %5 = arith.addf %2, %4 : vector<8x128xf32>
    %cst_5 = arith.constant dense<0xFF800000> : vector<8xf32>
    %6 = vector.multi_reduction <maximumf>, %5, %cst_5 [1] : vector<8x128xf32> to vector<8xf32>
    %7 = vector.shape_cast %6 : vector<8xf32> to vector<8x1xf32>
    %8 = vector.broadcast %7 : vector<8x1xf32> to vector<8x128xf32>
    %9 = arith.subf %5, %8 : vector<8x128xf32>
    %10 = math.exp %9 : vector<8x128xf32>
    %cst_6 = arith.constant dense<0.000000e+00> : vector<8xf32>
    %11 = vector.multi_reduction <add>, %10, %cst_6 [1] : vector<8x128xf32> to vector<8xf32>
    %12 = vector.shape_cast %11 : vector<8xf32> to vector<8x1xf32>
    %13 = vector.broadcast %12 : vector<8x1xf32> to vector<8x128xf32>
    %14 = arith.divf %10, %13 : vector<8x128xf32>
    %c0_7 = arith.constant 0 : index
    %c0_8 = arith.constant 0 : index
    %15 = vector.load %arg4[%c0_7, %c0_8] : memref<8x128xf32, #tpu.memory_space<vmem>>, vector<8x128xf32>
    tpu.vector_store %arg4[%c0_7, %c0_8], %14 {strides = array<i32>} : memref<8x128xf32, #tpu.memory_space<vmem>>, vector<8x128xf32>,
    return
  }
  func.func @transform_0(%arg0: i32) -> (i32, i32) {
    %c0_i32 = arith.constant 0 : i32
    %c0_i32_0 = arith.constant 0 : i32
    return %arg0, %c0_i32 : i32, i32
  }
  func.func @transform_1(%arg0: i32) -> (i32, i32) {
    %c0_i32 = arith.constant 0 : i32
    %c0_i32_0 = arith.constant 0 : i32
    %c0_i32_1 = arith.constant 0 : i32
    return %c0_i32, %c0_i32_0 : i32, i32
  }
  func.func @transform_2(%arg0: i32) -> (i32, i32) {
    %c0_i32 = arith.constant 0 : i32
    %c0_i32_0 = arith.constant 0 : i32
    %c0_i32_1 = arith.constant 0 : i32
    return %c0_i32, %c0_i32_0 : i32, i32
  }
  func.func @transform_3(%arg0: i32) -> (i32, i32) {
    %c0_i32 = arith.constant 0 : i32
    %c0_i32_0 = arith.constant 0 : i32
    return %arg0, %c0_i32 : i32, i32
  }
}

</mosaic_0001>

<bundles_post_ra>
// kernel: _dense_softmax_pallas.1
= control target key start
LH: loop header
LB: loop body
LE: loop exit
PB: predicated region body
PF: predicated region fallthrough
CT: control target
= control target key end

     0   :  { %v164_v1 = vmov 0.0   ;;  %vm165_vm0 = vmmov 0   ;;  %s202_s0 = inlined_call_operand.vmem [shape: f32[8,16], index: 0, kind: input, shape index: {}]   ;;  %s203_s1 = inlined_call_operand.vmem [shape: f32[16,128], index: 1, kind: input, shape index: {}]   ;;  %s204_s2 = inlined_call_operand.vmem [shape: f32[1,128], index: 2, kind: input, shape index: {}]   ;;  %s205_s3 = inlined_call_operand.hbm [shape: f32[8,128], index: 3, kind: output, shape index: {}]  }
   0x1   :  { %v17_v0 = vld [vmem:[%s203_s1 + $0x8] sm:$0xff]  ;;  %128 = vmatprep.subr.mxu0 %v164_v1  ;;  %v16_v2 = vld [vmem:[%s203_s1] sm:$0xff]  ;;  %132 = vmatprep.mubr.msk.f32.mxu0 %vm165_vm0, %v164_v1 }
   0x2   :  { %8 = vsyncpa [#allocation3], 0  ;;  %129 = vmatpush3.msra.mxu0 %v17_v0  ;;  %v15_v3 = vld [vmem:[%s202_s0] sm:$0xff]  ;;  %vm25_vm1 = vcmask 130048   ;;  %s166_s0 = smov [#allocation2]  }
   0x3   :  { %130 = vmatprep.subr.mxu0 %v164_v1  ;;  %v123_v4 = vld [vmem:[%s204_s2] ss:$0 sm:$0xff]  ;;  %s115_s1 = sshll.u32 %s166_s0, 4  ;;  %s116_s1 = int_to_ptr.vmem [resolvable:$true] %s115_s1 }
   0x4   :  { %131 = vmatpush3.msra.mxu0 %v16_v2  ;;  %s142_s20 = scalar_lea.vmem %s116_s1, 128  ;;  %p147_p1 = scmp.lt.s32.totalorder %s116_s1, %s116_s1 }
   0x5   :  { %133 = vmatmul.mubr.msk.f32.vlgmr.msra.gmra.mxu0 %vm25_vm1, %v15_v3  ;;  %p143_p0 = scmp.ne.s32.totalorder %s116_s1, %s142_s20  ;;  %p148_p2 = scmp.lt.s32.totalorder %s142_s20, %s142_s20 }
   0x7   :  { %p149_p3 = por %p148_p2, %p147_p1 }
   0x9   :  { %p150_p4 = pnand %p149_p3, %p143_p0 }
  0xc5   :  { %v95_v5 = vpop.f32.mrf.mxu0 }
  0xc6   :  { %v96_v6 = vadd.f32 %v123_v4, %v95_v5 }
  0xc7   :  { %v134_v7 = vpop.f32.mrf.mxu0 }
  0xc8   :  { %99 = vmax.xlane.f32.xlu0 %v96_v6 }
 0x151   :  { %v100_v8 = vpop.xlane.xlu0 %99 }
 0x152   :  { %v101_v9 = vsub.f32 %v96_v6, %v100_v8 }
 0x154   :  { %v102_v10 = vmul.f32 1.442695, %v101_v9 }
 0x156   :  { %138 = vpow2.f32 %v102_v10 }
 0x163   :  { %v139_v11 = vpop.eup %138 }
 0x164   :  { %104 = vadd.xlane.f32.xlu0 %v139_v11 }
 0x1ed   :  { %v105_v12 = vpop.xlane.xlu0 %104 }
 0x1ee   :  { %140 = vrcp.f32 %v105_v12 }
 0x1fb   :  { %v141_v13 = vpop.eup %140 }
 0x1fc   :  { %v107_v14 = vmul.f32 %v141_v13, %v139_v11 }
 0x1fe   :  { %108 = vst [vmem:[#allocation2] sm:$0xff] %v107_v14 }
 0x1ff   :  { %153 = shalt.err (!%p150_p4)
}
 0x200   :  { %118 = dma.vmem_to_hbm [thread:$0]  %s116_s1, 128, %s205_s3, [#allocation3]  }
 0x201   :  { %162 = dma.done.wait [#allocation3], 128  }
 0x202   :  { %163 = vsyncadd [#allocation3], 4294967168 }
 0x203   :  { %122 = vsyncpa [#allocation3], 1 }

</bundles_post_ra>
